<compile_context>
chip_gen: v5e
topology: v5e:2x2
jax: 0.10.0
libtpu: 0.0.40
codegen_flags: <defaults>
</compile_context>

<pallas_src>
from functools import partial

import jax
import jax.numpy as jnp
from jax import lax
from jax.experimental import pallas as pl
from jax.experimental.pallas import tpu as pltpu


def head_kernel(x_ref, w_ref, o_ref, *, head_size):
    # x_ref: (Bblk, T, C) bf16   w_ref: (C, 2H+Hp) bf16   o_ref: (Bblk, T, Hp) bf16
    Bblk, T, C = x_ref.shape
    Hp = o_ref.shape[-1]
    H = head_size

    # Fused QKV projection on the flattened (Bblk*T, C) slab (bf16 MXU, f32 acc).
    x2 = x_ref[...].reshape(Bblk * T, C)
    qkv = jnp.dot(x2, w_ref[...], preferred_element_type=jnp.float32)
    qkv = qkv.reshape(Bblk, T, 2 * H + Hp)

    # Weight layout is [q(H) | k(H) | v(Hp)]; the 1/sqrt(C) scale is already
    # folded into the q columns by the wrapper.
    q = qkv[:, :, 0:H].astype(jnp.bfloat16)                    # (Bblk, T, H)
    k = qkv[:, :, H:2 * H].astype(jnp.bfloat16)                # (Bblk, T, H)
    v = qkv[:, :, 2 * H:2 * H + Hp].astype(jnp.bfloat16)       # (Bblk, T, Hp)

    # Scores: contract the head dim of both operands (no explicit transpose).
    s = jnp.einsum("bqh,bkh->bqk", q, k,
                   preferred_element_type=jnp.float32)         # (Bblk, T, T)

    # Causal (lower-triangular) mask == masked_fill(tril == 0, -inf),
    # fused into the softmax: the masked score slab is never materialized.
    row = lax.broadcasted_iota(jnp.int32, (T, T), 0)
    col = lax.broadcasted_iota(jnp.int32, (T, T), 1)
    causal = (col <= row)[None, :, :]

    m = jnp.max(jnp.where(causal, s, -jnp.inf), axis=-1, keepdims=True)
    e = jnp.where(causal, jnp.exp(s - m), 0.0)
    denom = jnp.sum(e, axis=-1, keepdims=True)
    p = (e * pl.reciprocal(denom, approx=True)).astype(jnp.bfloat16)

    # (dropout == identity at inference)

    out = jnp.einsum("bqk,bkh->bqh", p, v,
                     preferred_element_type=jnp.float32)       # (Bblk, T, Hp)
    o_ref[...] = out.astype(o_ref.dtype)                       # bf16, lane-dense


def _pick_batch_block(B, max_blk=4):
    # Keep the grid length >= 2 whenever B >= 2 (dual-TC sharding on v7x and
    # DMA/compute overlap everywhere), and cap the block at 4 so the working
    # set stays inside v5e's scoped-VMEM budget.
    cap = max(1, min(max_blk, B // 2)) if B >= 2 else 1
    for blk in range(cap, 0, -1):
        if B % blk == 0:
            return blk
    return 1


def head_forward(x, w_key, w_query, w_value, *, batch_block=None):
    """x: (B, T, C) float32; w_*: (C, H) float32 -> (B, T, H) float32."""
    B, T, C = x.shape
    H = w_key.shape[1]
    assert T % 8 == 0, "T must be a multiple of 8 for clean TPU layout"

    # Pad only the V / output path up to a lane-dense multiple of 128 so the
    # kernel's stores are unmasked 128-lane vst; the padding columns are zero.
    Hp = ((H + 127) // 128) * 128

    # Fold the PyTorch C**-0.5 scale into the query weight (one-time cost).
    scale = C ** -0.5
    w_v_pad = jnp.pad(w_value, ((0, 0), (0, Hp - H)))
    # Fused weight in the order the kernel slices: [query | key | value_padded].
    w_qkv = jnp.concatenate([w_query * scale, w_key, w_v_pad], axis=1)  # (C, 2H+Hp)

    # bf16 operands: MXU-native on v5e/v6e/v7x, halves HBM/VMEM traffic.
    x_bf = x.astype(jnp.bfloat16)
    w_bf = w_qkv.astype(jnp.bfloat16)

    if batch_block is None:
        batch_block = _pick_batch_block(B)
    assert B % batch_block == 0
    grid = (B // batch_block,)

    cols = 2 * H + Hp

    grid_spec = pltpu.PrefetchScalarGridSpec(
        num_scalar_prefetch=0,
        grid=grid,
        in_specs=[
            pl.BlockSpec((batch_block, T, C), lambda b: (b, 0, 0)),   # x
            pl.BlockSpec((C, cols), lambda b: (0, 0)),                # fused W (grid-invariant)
        ],
        out_specs=pl.BlockSpec((batch_block, T, Hp), lambda b: (b, 0, 0)),
    )

    flops = 2 * B * T * (C * cols + T * H + T * Hp)
    bytes_accessed = (B * T * C * 2) + (C * cols * 2) + (B * T * Hp * 2)
    cost = pl.CostEstimate(flops=flops,
                           transcendentals=B * T * T,
                           bytes_accessed=bytes_accessed)

    # ~12 MiB working set at Bblk=4, T=256 (x/out/W pipeline buffers plus the
    # f32 qkv and score/exp slabs). 32 MiB raises v5e's 16 MiB scoped default,
    # matches v6e/v7x defaults, and stays well under every gen's physical VMEM.
    vmem_limit_bytes = 32 * 1024 * 1024

    out_padded = pl.pallas_call(
        partial(head_kernel, head_size=H),
        out_shape=jax.ShapeDtypeStruct((B, T, Hp), jnp.bfloat16),
        grid_spec=grid_spec,
        compiler_params=pltpu.CompilerParams(
            dimension_semantics=("parallel",),
            vmem_limit_bytes=vmem_limit_bytes,
        ),
        cost_estimate=cost,
    )(x_bf, w_bf)

    # Drop the zero padding columns and upcast; layout plumbing only.
    return out_padded[..., :H].astype(x.dtype)


def head_reference_f32(x, w_key, w_query, w_value):
    """Pure-JAX fp32 reference matching the PyTorch forward (eval mode)."""
    B, T, C = x.shape
    k = x @ w_key
    q = x @ w_query
    v = x @ w_value
    wei = (q @ jnp.swapaxes(k, -2, -1)) * (C ** -0.5)
    mask = jnp.tril(jnp.ones((T, T), dtype=bool))
    wei = jnp.where(mask[None, :, :], wei, -jnp.inf)
    wei = jax.nn.softmax(wei, axis=-1)
    return wei @ v


def head_reference_bf16(x, w_key, w_query, w_value):
    """Reference with the same bf16 matmul precision / rounding as the kernel."""
    B, T, C = x.shape
    scale = C ** -0.5
    xb = x.astype(jnp.bfloat16)
    wq = (w_query * scale).astype(jnp.bfloat16)
    wk = w_key.astype(jnp.bfloat16)
    wv = w_value.astype(jnp.bfloat16)
    q = jnp.einsum("btc,ch->bth", xb, wq,
                   preferred_element_type=jnp.float32).astype(jnp.bfloat16)
    k = jnp.einsum("btc,ch->bth", xb, wk,
                   preferred_element_type=jnp.float32).astype(jnp.bfloat16)
    v = jnp.einsum("btc,ch->bth", xb, wv,
                   preferred_element_type=jnp.float32).astype(jnp.bfloat16)
    wei = jnp.einsum("bqh,bkh->bqk", q, k, preferred_element_type=jnp.float32)
    mask = jnp.tril(jnp.ones((T, T), dtype=bool))
    wei = jnp.where(mask[None, :, :], wei, -jnp.inf)
    wei = jax.nn.softmax(wei, axis=-1).astype(jnp.bfloat16)
    out = jnp.einsum("bqk,bkh->bqh", wei, v, preferred_element_type=jnp.float32)
    return out.astype(jnp.bfloat16).astype(jnp.float32)


if __name__ == "__main__":
    # Shapes consistent with the module: C = n_embd = 512, T <= block_size = 256,
    # head_size = 64 (typical n_embd // n_heads).  Small B and T for the test.
    B, T, C, H = 2, 16, 512, 64

    key = jax.random.PRNGKey(0)
    kx, kk, kq, kv = jax.random.split(key, 4)

    x = jax.random.normal(kx, (B, T, C), dtype=jnp.float32)
    # Deterministic "Linear" weights, stored as (C, H) so y = x @ W.
    w_key = jax.random.normal(kk, (C, H), dtype=jnp.float32) * (C ** -0.5)
    w_query = jax.random.normal(kq, (C, H), dtype=jnp.float32) * (C ** -0.5)
    w_value = jax.random.normal(kv, (C, H), dtype=jnp.float32) * (C ** -0.5)

    out = head_forward(x, w_key, w_query, w_value)
    out = jax.block_until_ready(out)
    assert out.shape == (B, T, H)

    # Tight check vs. a reference with matching bf16 matmul precision.
    ref_bf = head_reference_bf16(x, w_key, w_query, w_value)
    assert jnp.allclose(out, ref_bf, atol=2e-2, rtol=2e-2)

    # Looser sanity check vs. the exact fp32 PyTorch-equivalent reference.
    ref_f32 = head_reference_f32(x, w_key, w_query, w_value)
    assert jnp.allclose(out, ref_f32, atol=1e-1, rtol=1e-1)

    print("KERNEL_OK")
</pallas_src>

<mosaic_0001>
module attributes {stable_mosaic.version = 11 : i64} {
  func.func @head_kernel(%arg0: i32, %arg1: memref<1x16x512xbf16, #tpu.memory_space<vmem>>, %arg2: memref<512x256xbf16, #tpu.memory_space<vmem>>, %arg3: memref<1x16x128xbf16, #tpu.memory_space<vmem>>) attributes {dimension_semantics = [#tpu.dimension_semantics<parallel>], iteration_bounds = array<i64: 2>, scalar_prefetch = 0 : i64, scratch_operands = 0 : i64, tpu.core_type = #tpu.core_type<tc>, window_params = [{transform_indices = @transform_0, window_bounds = array<i64: 1, 16, 512>}, {pipeline_mode = #tpu.pipeline_mode<synchronous>, transform_indices = @transform_1, window_bounds = array<i64: 512, 256>}, {transform_indices = @transform_2, window_bounds = array<i64: 1, 16, 128>}]} {
    %c0 = arith.constant 0 : index
    %c0_0 = arith.constant 0 : index
    %c0_1 = arith.constant 0 : index
    %0 = vector.load %arg1[%c0, %c0_0, %c0_1] : memref<1x16x512xbf16, #tpu.memory_space<vmem>>, vector<1x16x512xbf16>
    %1 = vector.shape_cast %0 : vector<1x16x512xbf16> to vector<16x512xbf16>
    %c0_2 = arith.constant 0 : index
    %c0_3 = arith.constant 0 : index
    %2 = vector.load %arg2[%c0_2, %c0_3] : memref<512x256xbf16, #tpu.memory_space<vmem>>, vector<512x256xbf16>
    %cst = arith.constant dense<0.000000e+00> : vector<16x256xf32>
    %3 = tpu.matmul %1, %2, %cst {dimension_numbers = #tpu.dot_dimension_numbers<[1], [0], [0], [1], [0, 0, 1, 1], [], []>} : vector<16x512xbf16>, vector<512x256xbf16>, vector<16x256xf32> -> vector<16x256xf32>
    %4 = vector.shape_cast %3 : vector<16x256xf32> to vector<1x16x256xf32>
    %5 = vector.extract_strided_slice %4 {offsets = [0, 0, 0], sizes = [1, 16, 64], strides = [1, 1, 1]} : vector<1x16x256xf32> to vector<1x16x64xf32>
    %6 = arith.truncf %5 : vector<1x16x64xf32> to vector<1x16x64xbf16>
    %7 = vector.extract_strided_slice %4 {offsets = [0, 0, 64], sizes = [1, 16, 64], strides = [1, 1, 1]} : vector<1x16x256xf32> to vector<1x16x64xf32>
    %8 = arith.truncf %7 : vector<1x16x64xf32> to vector<1x16x64xbf16>
    %9 = vector.extract_strided_slice %4 {offsets = [0, 0, 128], sizes = [1, 16, 128], strides = [1, 1, 1]} : vector<1x16x256xf32> to vector<1x16x128xf32>
    %10 = arith.truncf %9 : vector<1x16x128xf32> to vector<1x16x128xbf16>
    "tpu.trace_start"() <{level = 10 : i32, message = "bqh,bkh->bqk"}> : () -> ()
    %cst_4 = arith.constant dense<0.000000e+00> : vector<1x16x16xf32>
    %11 = tpu.matmul %6, %8, %cst_4 {dimension_numbers = #tpu.dot_dimension_numbers<[2], [2], [1], [1], [0, 0, 0, 1, 1, 1], [0], [0]>} : vector<1x16x64xbf16>, vector<1x16x64xbf16>, vector<1x16x16xf32> -> vector<1x16x16xf32>
    "tpu.trace_stop"() : () -> ()
    %12 = tpu.iota {dimensions = array<i32: 0>} : vector<16x16xi32>
    %13 = tpu.iota {dimensions = array<i32: 1>} : vector<16x16xi32>
    %14 = arith.cmpi sle, %13, %12 : vector<16x16xi32>
    %15 = vector.shape_cast %14 : vector<16x16xi1> to vector<1x16x16xi1>
    %cst_5 = arith.constant 0xFF800000 : f32
    %16 = vector.broadcast %cst_5 : f32 to vector<1x16x16xf32>
    %17 = arith.select %15, %11, %16 : vector<1x16x16xi1>, vector<1x16x16xf32>
    %cst_6 = arith.constant dense<0xFF800000> : vector<1x16xf32>
    %18 = vector.multi_reduction <maximumf>, %17, %cst_6 [2] : vector<1x16x16xf32> to vector<1x16xf32>
    %19 = vector.shape_cast %18 : vector<1x16xf32> to vector<1x16x1xf32>
    %20 = vector.broadcast %19 : vector<1x16x1xf32> to vector<1x16x16xf32>
    %21 = arith.subf %11, %20 : vector<1x16x16xf32>
    %22 = math.exp %21 : vector<1x16x16xf32>
    %cst_7 = arith.constant 0.000000e+00 : f32
    %23 = vector.broadcast %cst_7 : f32 to vector<1x16x16xf32>
    %24 = arith.select %15, %22, %23 : vector<1x16x16xi1>, vector<1x16x16xf32>
    %cst_8 = arith.constant dense<0.000000e+00> : vector<1x16xf32>
    %25 = vector.multi_reduction <add>, %24, %cst_8 [2] : vector<1x16x16xf32> to vector<1x16xf32>
    %26 = vector.shape_cast %25 : vector<1x16xf32> to vector<1x16x1xf32>
    %27 = tpu.reciprocal %26 {approx = true} : vector<1x16x1xf32> -> vector<1x16x1xf32>
    %28 = vector.broadcast %27 : vector<1x16x1xf32> to vector<1x16x16xf32>
    %29 = arith.mulf %24, %28 : vector<1x16x16xf32>
    %30 = arith.truncf %29 : vector<1x16x16xf32> to vector<1x16x16xbf16>
    "tpu.trace_start"() <{level = 10 : i32, message = "bqk,bkh->bqh"}> : () -> ()
    %cst_9 = arith.constant dense<0.000000e+00> : vector<1x16x128xf32>
    %31 = tpu.matmul %30, %10, %cst_9 {dimension_numbers = #tpu.dot_dimension_numbers<[2], [1], [1], [2], [0, 0, 0, 1, 1, 2], [0], [0]>} : vector<1x16x16xbf16>, vector<1x16x128xbf16>, vector<1x16x128xf32> -> vector<1x16x128xf32>
    "tpu.trace_stop"() : () -> ()
    %32 = arith.truncf %31 : vector<1x16x128xf32> to vector<1x16x128xbf16>
    %c0_10 = arith.constant 0 : index
    %c0_11 = arith.constant 0 : index
    %c0_12 = arith.constant 0 : index
    %33 = vector.load %arg3[%c0_10, %c0_11, %c0_12] : memref<1x16x128xbf16, #tpu.memory_space<vmem>>, vector<1x16x128xbf16>
    tpu.vector_store %arg3[%c0_10, %c0_11, %c0_12], %32 {strides = array<i32>} : memref<1x16x128xbf16, #tpu.memory_space<vmem>>, vector<1x16x128xbf16>,
    return
  }
  func.func @transform_0(%arg0: i32) -> (i32, i32, i32) {
    %c0_i32 = arith.constant 0 : i32
    %c0_i32_0 = arith.constant 0 : i32
    %c0_i32_1 = arith.constant 0 : i32
    return %arg0, %c0_i32, %c0_i32_0 : i32, i32, i32
  }
  func.func @transform_1(%arg0: i32) -> (i32, i32) {
    %c0_i32 = arith.constant 0 : i32
    %c0_i32_0 = arith.constant 0 : i32
    %c0_i32_1 = arith.constant 0 : i32
    return %c0_i32, %c0_i32_0 : i32, i32
  }
  func.func @transform_2(%arg0: i32) -> (i32, i32, i32) {
    %c0_i32 = arith.constant 0 : i32
    %c0_i32_0 = arith.constant 0 : i32
    %c0_i32_1 = arith.constant 0 : i32
    return %arg0, %c0_i32, %c0_i32_0 : i32, i32, i32
  }
}

</mosaic_0001>

<bundles_post_ra>
// kernel: tpu_custom_call.1
= control target key start
LH: loop header
LB: loop body
LE: loop exit
PB: predicated region body
PF: predicated region fallthrough
CT: control target
= control target key end

     0   :  { %7 = vsyncpa [#allocation3], 0  ;;  %s1670_s0 = inlined_call_operand.hbm [shape: bf16[2,16,512], index: 0, kind: input, shape index: {}]   ;;  %s1671_s1 = inlined_call_operand.hbm [shape: bf16[512,256], index: 1, kind: input, shape index: {}]   ;;  %s1672_s2 = inlined_call_operand.hbm [shape: bf16[2,16,128], index: 2, kind: output, shape index: {}]  }
   0x1   :  { %9 = vsyncpa [#allocation3 + $0x1], 0 }
   0x2   :  { %10 = vsyncpa [#allocation6], 0 }
   0x3   :  { %11 = vsyncpa [#allocation4], 0 }
   0x4   :  { %13 = vsyncpa [#allocation4 + $0x1], 0  ;;  %s1491_s9 = smov 0   ;;  %s1493_s10 = smov 0  }
   0x5   :  { %s1495_s11 = smov 0   ;;  %s1497_s12 = smov 0  }
   0x6 LB: > { %s1512_s13 = sadd.s32 4294967295, %s1467_s12   ;;  %s901_s14 = sadd.s32 4294967294, %s1467_s12   ;;  %s1467_s12 = sphi %s1497_s12, %s1682_s12   ;;  %s1463_s11 = sphi %s1495_s11, %s1681_s11   ;;  %s1459_s10 = sphi %s1493_s10, %s1680_s10   ;;  %s1455_s9 = sphi %s1491_s9, %s1679_s9  }
   0x7   : > { %p39_p0 = scmp.ne.s32.totalorder %s1459_s10, %s1455_s9  ;;  %p40_p1 = scmp.eq.s32.totalorder %s1512_s13, 0 }
   0x8   : > { %p84_p2 = scmp.eq.s32.totalorder %s1512_s13, 1  ;;  %p90_p3 = scmp.eq.s32.totalorder %s901_s14, 1 }
   0x9   : > { %p1521_p4 = por %p40_p1, %p39_p0  ;;  %p902_p5 = scmp.ge.s32.totalorder %s1467_s12, 1 }
   0xa   : > { %p1526_p6 = por %p90_p3, %p39_p0  ;;  %p97_p7 = scmp.lt.s32.totalorder %s1467_s12, 3 }
   0xb   : > { %s108_s19 = sshll.u32 %s1671_s1, 4  ;;  %s1469_s21 = smov [#allocation5]   ;;  %s109_s19 = int_to_ptr.hbm [resolvable:$true] %s108_s19 }
   0xc   : > { %p1534_p8 = pnand %p902_p5, %p97_p7  ;;  %s110_s22 = sshll.u32 %s1469_s21, 4  ;;  %s111_s22 = int_to_ptr.vmem [resolvable:$true] %s110_s22 }
   0xd   : > { %s1544_s23 = sadd.s32 1, %s1467_s12   ;;  %s1470_s24 = smov 128  }
   0xe   : > { %p1274_p9 = pneg %p1534_p8  ;;  %s1471_s25 = smov 8  }
   0xf   : > { %s23_s26 = ssub.s32 %s1467_s12, %s1544_s23  ;;  %s26_s27 = sadd.s32 1, %s1463_s11 }
  0x10   : > { %p1275_p10 = pnand %p1274_p9, %p40_p1  ;;  %p24_p12 = scmp.eq.s32.totalorder %s23_s26, 0 }
  0x11   : > { %p33_p13 = scmp.ne.s32.totalorder %s1463_s11, %s1459_s10  ;;  %p34_p0 = scmp.eq.s32.totalorder %s1467_s12, 0 }
  0x12   : > { %1277 = dma.hbm_to_vmem [thread:$0]  (!%p1275_p10), %s109_s19, 8192, %s111_s22, [#allocation6], %s1470_s24, %s1470_s24, %s1471_s25  }
  0x13   : > { %p1287_p3 = scmp.lt.s32.totalorder %s1467_s12, 2  ;;  %p35_p5 = por %p34_p0, %p33_p13 }
  0x14   : > { %s1554_s28 = scalar_select %p24_p12, %s1463_s11, %s26_s27  }
  0x15   : > { %p1558_p7 = por %p84_p2, %p33_p13  ;;  %s124_s30 = sand.u32 1, %s1463_s11  }
  0x16   : > { %s1191_s3 = sshll.u32 %s1467_s12, 5  ;;  %s905_s4 = sshll.u32 %s124_s30, 5 }
  0x17   : > { %s133_s7 = scalar_lea.hbm %s1670_s0, %s1191_s3  ;;  %s128_s14 = scalar_lea.vmem [#allocation2], %s905_s4 }
  0x18   : > { %s134_s8 = sshll.u32 %s133_s7, 4  ;;  %s136_s17 = sshll.u32 %s128_s14, 4  ;;  %s135_s8 = int_to_ptr.hbm [resolvable:$true] %s134_s8  ;;  %s137_s17 = int_to_ptr.vmem [resolvable:$true] %s136_s17 }
  0x19   : > { %p1569_p9 = pnand %p1287_p3, %p35_p5  ;;  %s125_s19 = scalar_lea.sflag [#allocation3], %s124_s30 }
  0x1a   : > { %s1367_s21 = sshra.s32 %s135_s8, 4  ;;  %s1374_s26 = scalar_lea.hbm %s1670_s0, 64  ;;  %s1368_s21 = int_to_ptr.hbm [resolvable:$true] %s1367_s21 }
  0x1b   : > { %s1369_s22 = scalar_lea.hbm %s1368_s21, 32  ;;  %p1371_p10 = pneg %p1569_p9 }
  0x1c   : > { %p1370_p2 = scmp.ne.s32.totalorder %s1368_s21, %s1369_s22  ;;  %p1375_p0 = scmp.lt.s32.totalorder %s1368_s21, %s1670_s0 }
  0x1d   : > { %p1376_p3 = scmp.lt.s32.totalorder %s1374_s26, %s1369_s22 }
  0x1e   : > { %p1372_p12 = pnand %p1371_p10, %p1370_p2 }
  0x1f   : > { %p1377_p5 = por %p1376_p3, %p1375_p0 }
  0x20   : > { %p1373_p13 = pneg %p1372_p12 }
  0x22   : > { %p1378_p11 = pnand %p1377_p5, %p1373_p13 }
  0x24   : > { %1381 = shalt.err (!%p1378_p11)
}
  0x25   : > { %s1472_s30 = smov 256   ;;  %s1473_s4 = smov 16  }
  0x26   : > { %1281 = dma.hbm_to_vmem [thread:$0]  (!%p1569_p9), %s135_s8, 512, %s137_s17, %s125_s19, %s1472_s30, %s1472_s30, %s1473_s4  }
  0x27   : > { %148 = sbr.rel (%p1534_p8) target bundleno = 892 (0x37c), region = 28  ;;  %s1586_s5 = sand.u32 (!%p1534_p8), 1, %s1459_s10  }
  0x28   : > { %s909_s6 = sshll.u32 (!%p1534_p8), %s1586_s5, 5  ;;  %s151_s7 = scalar_lea.sflag (!%p1534_p8), [#allocation3], %s1586_s5 }
  0x29   : > { %s1590_s14 = scalar_lea.vmem (!%p1534_p8), [#allocation2], %s909_s6 }
  0x2c   : > { %1442 = dma.done.wait (%p1521_p4), %s151_s7, 512  }
  0x2d   : > { %1444 = vsyncadd (%p1521_p4), %s151_s7, 4294966784 }
  0x2e   : > { %1446 = dma.done.wait (%p40_p1), [#allocation6], 8192  }
  0x2f   : > { %1448 = vsyncadd (%p40_p1), [#allocation6], 4294959104  ;;  %v986_v0 = vld [vmem:[#allocation5 + $0x70] sm:$0xf]  ;;  %v1211_v1 = vld [vmem:[#allocation5 + $0x74] sm:$0xf0] }
  0x30   : > { %v1050_v2 = vld [vmem:[#allocation5 + $0xf0] sm:$0xf]  ;;  %v987_v3 = vor.u32 %v1211_v1, %v986_v0  ;;  %v1227_v4 = vld [vmem:[#allocation5 + $0xf4] sm:$0xf0]  ;;  %v978_v11 = vld [vmem:[#allocation5 + $0x60] sm:$0xf] }
  0x31   : > { %v1114_v5 = vld [vmem:[#allocation5 + $0x170] sm:$0xf]  ;;  %v1243_v6 = vld [vmem:[#allocation5 + $0x174] sm:$0xf0]  ;;  %v1051_v7 = vor.u32 %v1227_v4, %v1050_v2  ;;  %v1209_v13 = vld [vmem:[#allocation5 + $0x64] sm:$0xf0] }
  0x32   : > { %v1115_v8 = vor.u32 %v1243_v6, %v1114_v5  ;;  %v1178_v9 = vld [vmem:[#allocation5 + $0x1f0] sm:$0xf]  ;;  %v1259_v10 = vld [vmem:[#allocation5 + $0x1f4] sm:$0xf0]  ;;  %590 = vmatpush.bf16.msra.mxu0 %v987_v3  ;;  %v1042_v14 = vld [vmem:[#allocation5 + $0xe0] sm:$0xf]  ;;  %v979_v16 = vor.u32 %v1209_v13, %v978_v11 }
  0x33   : > { %v1179_v12 = vor.u32 %v1259_v10, %v1178_v9  ;;  %v1225_v15 = vld [vmem:[#allocation5 + $0xe4] sm:$0xf0]  ;;  %604 = vmatpush.bf16.msra.mxu1 %v1051_v7  ;;  %v1106_v18 = vld [vmem:[#allocation5 + $0x160] sm:$0xf]  ;;  %v970_v23 = vld [vmem:[#allocation5 + $0x50] sm:$0xf] }
  0x34   : > { %618 = vmatpush.bf16.msra.mxu2 %v1115_v8  ;;  %v1043_v17 = vor.u32 %v1225_v15, %v1042_v14  ;;  %v1241_v19 = vld [vmem:[#allocation5 + $0x164] sm:$0xf0]  ;;  %v1170_v20 = vld [vmem:[#allocation5 + $0x1e0] sm:$0xf]  ;;  %v1207_v24 = vld [vmem:[#allocation5 + $0x54] sm:$0xf0] }
  0x35   : > { %632 = vmatpush.bf16.msra.mxu3 %v1179_v12  ;;  %v1107_v21 = vor.u32 %v1241_v19, %v1106_v18  ;;  %v1257_v22 = vld [vmem:[#allocation5 + $0x1e4] sm:$0xf0]  ;;  %v1034_v26 = vld [vmem:[#allocation5 + $0xd0] sm:$0xf]  ;;  %v1223_v27 = vld [vmem:[#allocation5 + $0xd4] sm:$0xf0]  ;;  %v971_v29 = vor.u32 %v1207_v24, %v970_v23 }
  0x36   : > { %v1171_v25 = vor.u32 %v1257_v22, %v1170_v20  ;;  %v1098_v28 = vld [vmem:[#allocation5 + $0x150] sm:$0xf]  ;;  %591 = vmatpush.bf16.msra.mxu0 %v979_v16  ;;  %v1239_v30 = vld [vmem:[#allocation5 + $0x154] sm:$0xf0]  ;;  %v1035_v33 = vor.u32 %v1223_v27, %v1034_v26  ;;  %v962_v35 = vld [vmem:[#allocation5 + $0x40] sm:$0xf] }
  0x37   : > { %v1162_v31 = vld [vmem:[#allocation5 + $0x1d0] sm:$0xf]  ;;  %v1255_v32 = vld [vmem:[#allocation5 + $0x1d4] sm:$0xf0]  ;;  %605 = vmatpush.bf16.msra.mxu1 %v1043_v17  ;;  %v1099_v34 = vor.u32 %v1239_v30, %v1098_v28  ;;  %v1205_v36 = vld [vmem:[#allocation5 + $0x44] sm:$0xf0] }
  0x38   : > { %619 = vmatpush.bf16.msra.mxu2 %v1107_v21  ;;  %v1026_v37 = vld [vmem:[#allocation5 + $0xc0] sm:$0xf]  ;;  %v1163_v38 = vor.u32 %v1255_v32, %v1162_v31  ;;  %v1221_v39 = vld [vmem:[#allocation5 + $0xc4] sm:$0xf0]  ;;  %v963_v44 = vor.u32 %v1205_v36, %v962_v35  ;;  %v954_v47 = vld [vmem:[#allocation5 + $0x30] sm:$0xf] }
  0x39   : > { %633 = vmatpush.bf16.msra.mxu3 %v1171_v25  ;;  %v1090_v40 = vld [vmem:[#allocation5 + $0x140] sm:$0xf]  ;;  %v1237_v41 = vld [vmem:[#allocation5 + $0x144] sm:$0xf0]  ;;  %v1027_v45 = vor.u32 %v1221_v39, %v1026_v37  ;;  %v1203_v48 = vld [vmem:[#allocation5 + $0x34] sm:$0xf0] }
  0x3a   : > { %v1154_v42 = vld [vmem:[#allocation5 + $0x1c0] sm:$0xf]  ;;  %v1253_v43 = vld [vmem:[#allocation5 + $0x1c4] sm:$0xf0]  ;;  %592 = vmatpush.bf16.msra.mxu0 %v971_v29  ;;  %v1091_v46 = vor.u32 %v1237_v41, %v1090_v40  ;;  %v1018_v49 = vld [vmem:[#allocation5 + $0xb0] sm:$0xf]  ;;  %v955_v56 = vor.u32 %v1203_v48, %v954_v47 }
  0x3b   : > { %606 = vmatpush.bf16.msra.mxu1 %v1035_v33  ;;  %v1155_v50 = vor.u32 %v1253_v43, %v1154_v42  ;;  %v1219_v51 = vld [vmem:[#allocation5 + $0xb4] sm:$0xf0]  ;;  %v1082_v52 = vld [vmem:[#allocation5 + $0x130] sm:$0xf]  ;;  %v946_v59 = vld [vmem:[#allocation5 + $0x20] sm:$0xf] }
  0x3c   : > { %620 = vmatpush.bf16.msra.mxu2 %v1099_v34  ;;  %v1235_v53 = vld [vmem:[#allocation5 + $0x134] sm:$0xf0]  ;;  %v1146_v54 = vld [vmem:[#allocation5 + $0x1b0] sm:$0xf]  ;;  %v1019_v57 = vor.u32 %v1219_v51, %v1018_v49  ;;  %v1201_v60 = vld [vmem:[#allocation5 + $0x24] sm:$0xf0] }
  0x3d   : > { %634 = vmatpush.bf16.msra.mxu3 %v1163_v38  ;;  %v1251_v55 = vld [vmem:[#allocation5 + $0x1b4] sm:$0xf0]  ;;  %v1083_v58 = vor.u32 %v1235_v53, %v1082_v52  ;;  %v1010_v61 = vld [vmem:[#allocation5 + $0xa0] sm:$0xf]  ;;  %v1217_v63 = vld [vmem:[#allocation5 + $0xa4] sm:$0xf0]  ;;  %v947_v4 = vor.u32 %v1201_v60, %v946_v59 }
  0x3e   : > { %593 = vmatpush.bf16.msra.mxu0 %v963_v44  ;;  %v1147_v62 = vor.u32 %v1251_v55, %v1146_v54  ;;  %v1074_v0 = vld [vmem:[#allocation5 + $0x120] sm:$0xf]  ;;  %v1233_v1 = vld [vmem:[#allocation5 + $0x124] sm:$0xf0]  ;;  %v1011_v5 = vor.u32 %v1217_v63, %v1010_v61  ;;  %v938_v7 = vld [vmem:[#allocation5 + $0x10] sm:$0xf] }
  0x3f   : > { %607 = vmatpush.bf16.msra.mxu1 %v1027_v45  ;;  %v1138_v2 = vld [vmem:[#allocation5 + $0x1a0] sm:$0xf]  ;;  %v1249_v3 = vld [vmem:[#allocation5 + $0x1a4] sm:$0xf0]  ;;  %v1075_v6 = vor.u32 %v1233_v1, %v1074_v0  ;;  %v1199_v8 = vld [vmem:[#allocation5 + $0x14] sm:$0xf0] }
  0x40   : > { %621 = vmatpush.bf16.msra.mxu2 %v1091_v46  ;;  %v1002_v9 = vld [vmem:[#allocation5 + $0x90] sm:$0xf]  ;;  %v1139_v10 = vor.u32 %v1249_v3, %v1138_v2  ;;  %v1215_v11 = vld [vmem:[#allocation5 + $0x94] sm:$0xf0]  ;;  %v939_v16 = vor.u32 %v1199_v8, %v938_v7  ;;  %v930_v19 = vld [vmem:[#allocation5] sm:$0xf] }
  0x41   : > { %635 = vmatpush.bf16.msra.mxu3 %v1155_v50  ;;  %v1066_v12 = vld [vmem:[#allocation5 + $0x110] sm:$0xf]  ;;  %v1231_v13 = vld [vmem:[#allocation5 + $0x114] sm:$0xf0]  ;;  %v1003_v17 = vor.u32 %v1215_v11, %v1002_v9  ;;  %v1197_v20 = vld [vmem:[#allocation5 + $0x4] sm:$0xf0] }
  0x42   : > { %594 = vmatpush.bf16.msra.mxu0 %v955_v56  ;;  %v1130_v14 = vld [vmem:[#allocation5 + $0x190] sm:$0xf]  ;;  %v1247_v15 = vld [vmem:[#allocation5 + $0x194] sm:$0xf0]  ;;  %v1067_v18 = vor.u32 %v1231_v13, %v1066_v12  ;;  %v994_v21 = vld [vmem:[#allocation5 + $0x80] sm:$0xf]  ;;  %v931_v28 = vor.u32 %v1197_v20, %v930_v19 }
  0x43   : > { %608 = vmatpush.bf16.msra.mxu1 %v1019_v57  ;;  %v1131_v22 = vor.u32 %v1247_v15, %v1130_v14  ;;  %v1213_v23 = vld [vmem:[#allocation5 + $0x84] sm:$0xf0]  ;;  %v1058_v24 = vld [vmem:[#allocation5 + $0x100] sm:$0xf]  ;;  %v1194_v30 = vld [vmem:[%s1590_s14 + $0xc] sm:$0xf0] }
  0x44   : > { %622 = vmatpush.bf16.msra.mxu2 %v1083_v58  ;;  %v1229_v25 = vld [vmem:[#allocation5 + $0x104] sm:$0xf0]  ;;  %v1122_v26 = vld [vmem:[#allocation5 + $0x180] sm:$0xf]  ;;  %v1192_v31 = vld [vmem:[%s1590_s14 + $0x4] sm:$0xf]  ;;  %v995_v32 = vor.u32 %v1213_v23, %v994_v21 }
  0x45   : > { %636 = vmatpush.bf16.msra.mxu3 %v1147_v62  ;;  %v1245_v27 = vld [vmem:[#allocation5 + $0x184] sm:$0xf0]  ;;  %v914_v29 = vld [vmem:[%s1590_s14] sm:$0xf]  ;;  %v1059_v33 = vor.u32 %v1229_v25, %v1058_v24  ;;  %v916_v34 = vld [vmem:[%s1590_s14 + $0x10] sm:$0xf0] }
  0x46   : > { %595 = vmatpush.bf16.msra.mxu0 %v947_v4  ;;  %v922_v35 = vld [vmem:[%s1590_s14 + $0x8] sm:$0xf]  ;;  %v1195_v36 = vld [vmem:[%s1590_s14 + $0x14] sm:$0xf0]  ;;  %v1123_v37 = vor.u32 %v1245_v27, %v1122_v26  ;;  %v1193_v38 = vld [vmem:[%s1590_s14 + $0xc] sm:$0xf]  ;;  %v1608_v40 = vor.u32 %v1194_v30, %v914_v29  ;;  %v1610_v41 = vor.u32 %v1192_v31, %v916_v34 }
  0x47   : > { %609 = vmatpush.bf16.msra.mxu1 %v1011_v5  ;;  %v924_v39 = vld [vmem:[%s1590_s14 + $0x18] sm:$0xf0]  ;;  %v1612_v42 = vor.u32 %v1195_v36, %v922_v35  ;;  %v1242_v44 = vld [vmem:[#allocation5 + $0x174] sm:$0xf]  ;;  %v1240_v55 = vld [vmem:[#allocation5 + $0x164] sm:$0xf] }
  0x48   : > { %623 = vmatpush.bf16.msra.mxu2 %v1075_v6  ;;  %v1614_v43 = vor.u32 %v1193_v38, %v924_v39  ;;  %v1116_v45 = vld [vmem:[#allocation5 + $0x178] sm:$0xf0]  ;;  %v1258_v46 = vld [vmem:[#allocation5 + $0x1f4] sm:$0xf]  ;;  %v1108_v57 = vld [vmem:[#allocation5 + $0x168] sm:$0xf0] }
  0x49   : > { %637 = vmatpush.bf16.msra.mxu3 %v1139_v10  ;;  %v1119_v47 = vor.u32 %v1242_v44, %v1116_v45  ;;  %v1180_v48 = vld [vmem:[#allocation5 + $0x1f8] sm:$0xf0]  ;;  %v1210_v49 = vld [vmem:[#allocation5 + $0x74] sm:$0xf]  ;;  %v1256_v58 = vld [vmem:[#allocation5 + $0x1e4] sm:$0xf]  ;;  %v1111_v60 = vor.u32 %v1240_v55, %v1108_v57 }
  0x4a   : > { %596 = vmatpush.bf16.msra.mxu0 %v939_v16  ;;  %v988_v50 = vld [vmem:[#allocation5 + $0x78] sm:$0xf0]  ;;  %v1183_v51 = vor.u32 %v1258_v46, %v1180_v48  ;;  %v1226_v53 = vld [vmem:[#allocation5 + $0xf4] sm:$0xf]  ;;  %v1172_v59 = vld [vmem:[#allocation5 + $0x1e8] sm:$0xf0] }
  0x4b   : > { %610 = vmatpush.bf16.msra.mxu1 %v1003_v17  ;;  %v991_v52 = vor.u32 %v1210_v49, %v988_v50  ;;  %v1052_v54 = vld [vmem:[#allocation5 + $0xf8] sm:$0xf0]  ;;  %v1175_v61 = vor.u32 %v1256_v58, %v1172_v59  ;;  %v1208_v62 = vld [vmem:[#allocation5 + $0x64] sm:$0xf]  ;;  %v980_v63 = vld [vmem:[#allocation5 + $0x68] sm:$0xf0] }
  0x4c   : > { %624 = vmatpush.bf16.msra.mxu2 %v1067_v18  ;;  %v1055_v56 = vor.u32 %v1226_v53, %v1052_v54  ;;  %v1224_v0 = vld [vmem:[#allocation5 + $0xe4] sm:$0xf]  ;;  %v983_v1 = vor.u32 %v1208_v62, %v980_v63  ;;  %v1044_v2 = vld [vmem:[#allocation5 + $0xe8] sm:$0xf0]  ;;  %v1238_v3 = vld [vmem:[#allocation5 + $0x154] sm:$0xf] }
  0x4d   : > { %638 = vmatpush.bf16.msra.mxu3 %v1131_v22  ;;  %v1100_v4 = vld [vmem:[#allocation5 + $0x158] sm:$0xf0]  ;;  %v1047_v5 = vor.u32 %v1224_v0, %v1044_v2  ;;  %v1254_v6 = vld [vmem:[#allocation5 + $0x1d4] sm:$0xf]  ;;  %v1236_v17 = vld [vmem:[#allocation5 + $0x144] sm:$0xf] }
  0x4e   : > { %597 = vmatpush.bf16.msra.mxu0 %v931_v28  ;;  %v1164_v7 = vld [vmem:[#allocation5 + $0x1d8] sm:$0xf0]  ;;  %v1206_v8 = vld [vmem:[#allocation5 + $0x54] sm:$0xf]  ;;  %v1103_v11 = vor.u32 %v1238_v3, %v1100_v4  ;;  %v1092_v18 = vld [vmem:[#allocation5 + $0x148] sm:$0xf0] }
  0x4f   : > { %611 = vmatpush.bf16.msra.mxu1 %v995_v32  ;;  %v972_v12 = vld [vmem:[#allocation5 + $0x58] sm:$0xf0]  ;;  %v1222_v13 = vld [vmem:[#allocation5 + $0xd4] sm:$0xf]  ;;  %v1167_v15 = vor.u32 %v1254_v6, %v1164_v7  ;;  %v1252_v19 = vld [vmem:[#allocation5 + $0x1c4] sm:$0xf]  ;;  %v1095_v27 = vor.u32 %v1236_v17, %v1092_v18 }
  0x50   : > { %625 = vmatpush.bf16.msra.mxu2 %v1059_v33  ;;  %v1036_v14 = vld [vmem:[#allocation5 + $0xd8] sm:$0xf0]  ;;  %v975_v16 = vor.u32 %v1206_v8, %v972_v12  ;;  %v1156_v21 = vld [vmem:[#allocation5 + $0x1c8] sm:$0xf0]  ;;  %v1204_v22 = vld [vmem:[#allocation5 + $0x44] sm:$0xf] }
  0x51   : > { %639 = vmatpush.bf16.msra.mxu3 %v1123_v37  ;;  %598 = vmatmul.bf16.vlgmr.msra.gmra.mxu0 %v1608_v40  ;;  %v1039_v20 = vor.u32 %v1222_v13, %v1036_v14  ;;  %v964_v23 = vld [vmem:[#allocation5 + $0x48] sm:$0xf0]  ;;  %v1220_v24 = vld [vmem:[#allocation5 + $0xc4] sm:$0xf]  ;;  %v1159_v28 = vor.u32 %v1252_v19, %v1156_v21  ;;  %v1234_v30 = vld [vmem:[#allocation5 + $0x134] sm:$0xf] }
  0x52   : > { %612 = vmatmul.bf16.vlgmr.msra.gmra.mxu1 %v1610_v41  ;;  %646 = vmatpush.bf16.msrb.mxu0 %v991_v52  ;;  %v1028_v25 = vld [vmem:[#allocation5 + $0xc8] sm:$0xf0]  ;;  %v967_v29 = vor.u32 %v1204_v22, %v964_v23  ;;  %v1084_v31 = vld [vmem:[#allocation5 + $0x138] sm:$0xf0]  ;;  %v1250_v32 = vld [vmem:[#allocation5 + $0x1b4] sm:$0xf] }
  0x53   : > { %626 = vmatmul.bf16.vlgmr.msra.gmra.mxu2 %v1612_v42  ;;  %660 = vmatpush.bf16.msrb.mxu1 %v1055_v56  ;;  %v1031_v34 = vor.u32 %v1220_v24, %v1028_v25  ;;  %v1148_v35 = vld [vmem:[#allocation5 + $0x1b8] sm:$0xf0]  ;;  %v1202_v36 = vld [vmem:[#allocation5 + $0x34] sm:$0xf]  ;;  %v1087_v46 = vor.u32 %v1234_v30, %v1084_v31  ;;  %v1232_v49 = vld [vmem:[#allocation5 + $0x124] sm:$0xf] }
  0x54   : > { %640 = vmatmul.bf16.vlgmr.msra.gmra.mxu3 %v1614_v43  ;;  %674 = vmatpush.bf16.msrb.mxu2 %v1119_v47  ;;  %v956_v37 = vld [vmem:[#allocation5 + $0x38] sm:$0xf0]  ;;  %v1218_v39 = vld [vmem:[#allocation5 + $0xb4] sm:$0xf]  ;;  %v1151_v47 = vor.u32 %v1250_v32, %v1148_v35  ;;  %v1076_v50 = vld [vmem:[#allocation5 + $0x128] sm:$0xf0] }
  0x55   : > { %688 = vmatpush.bf16.msrb.mxu3 %v1183_v51  ;;  %v1020_v44 = vld [vmem:[#allocation5 + $0xb8] sm:$0xf0]  ;;  %v959_v48 = vor.u32 %v1202_v36, %v956_v37  ;;  %v1248_v51 = vld [vmem:[#allocation5 + $0x1a4] sm:$0xf]  ;;  %v1140_v55 = vld [vmem:[#allocation5 + $0x1a8] sm:$0xf0] }
  0x56   : > { %647 = vmatpush.bf16.msrb.mxu0 %v983_v1  ;;  %v1023_v54 = vor.u32 %v1218_v39, %v1020_v44  ;;  %v1200_v56 = vld [vmem:[#allocation5 + $0x24] sm:$0xf]  ;;  %v948_v57 = vld [vmem:[#allocation5 + $0x28] sm:$0xf0]  ;;  %v1143_v63 = vor.u32 %v1248_v51, %v1140_v55  ;;  %v1230_v1 = vld [vmem:[#allocation5 + $0x114] sm:$0xf] }
  0x57   : > { %661 = vmatpush.bf16.msrb.mxu1 %v1047_v5  ;;  %v1216_v58 = vld [vmem:[#allocation5 + $0xa4] sm:$0xf]  ;;  %v1012_v59 = vld [vmem:[#allocation5 + $0xa8] sm:$0xf0]  ;;  %v951_v0 = vor.u32 %v1200_v56, %v948_v57  ;;  %v1068_v2 = vld [vmem:[#allocation5 + $0x118] sm:$0xf0]  ;;  %v734_v56 = vlaneseq }
  0x58   : > { %675 = vmatpush.bf16.msrb.mxu2 %v1111_v60  ;;  %v1246_v3 = vld [vmem:[#allocation5 + $0x194] sm:$0xf]  ;;  %v1015_v5 = vor.u32 %v1216_v58, %v1012_v59  ;;  %v1132_v6 = vld [vmem:[#allocation5 + $0x198] sm:$0xf0]  ;;  %v1071_v14 = vor.u32 %v1230_v1, %v1068_v2  ;;  %v1228_v18 = vld [vmem:[#allocation5 + $0x104] sm:$0xf] }
  0x59   : > { %689 = vmatpush.bf16.msrb.mxu3 %v1175_v61  ;;  %v1079_v61 = vor.u32 %v1232_v49, %v1076_v50  ;;  %v1198_v7 = vld [vmem:[#allocation5 + $0x14] sm:$0xf]  ;;  %v940_v8 = vld [vmem:[#allocation5 + $0x18] sm:$0xf0]  ;;  %v1060_v19 = vld [vmem:[#allocation5 + $0x108] sm:$0xf0] }
  0x5a   : > { %648 = vmatpush.bf16.msrb.mxu0 %v975_v16  ;;  %v1135_v16 = vor.u32 %v1246_v3, %v1132_v6  ;;  %v943_v17 = vor.u32 %v1198_v7, %v940_v8  ;;  %v1244_v21 = vld [vmem:[#allocation5 + $0x184] sm:$0xf]  ;;  %v1124_v22 = vld [vmem:[#allocation5 + $0x188] sm:$0xf0]  ;;  %s1474_s15 = smov 64   ;;  %vm713_vm0 = vcmask 523264  }
  0x5b   : > { %662 = vmatpush.bf16.msrb.mxu1 %v1039_v20  ;;  %v1196_v23 = vld [vmem:[#allocation5 + $0x4] sm:$0xf]  ;;  %v932_v25 = vld [vmem:[#allocation5 + $0x8] sm:$0xf0]  ;;  %v1127_v31 = vor.u32 %v1244_v21, %v1124_v22  ;;  %v735_v57 = vshrl.u32 %v734_v56, 7  ;;  %v738_v58 = vand.u32 127, %v734_v56 }
  0x5c   : > { %676 = vmatpush.bf16.msrb.mxu2 %v1103_v11  ;;  %v1004_v11 = vld [vmem:[#allocation5 + $0x98] sm:$0xf0]  ;;  %v935_v32 = vor.u32 %v1196_v23, %v932_v25  ;;  %vm743_vm2 = vcmask 130048   ;;  %s911_s20 = sshll.u32 %s1586_s5, 3  ;;  %s1260_s8 = sshll.u32 %s1512_s13, 3 }
  0x5d   : > { %690 = vmatpush.bf16.msrb.mxu3 %v1167_v15  ;;  %vm739_vm1 = vcmp.le.s32.totalorder %v738_v58, %v735_v57  ;;  %s814_s19 = scalar_lea.hbm %s1672_s2, %s1260_s8  ;;  %s180_s21 = scalar_lea.vmem [#allocation7], %s911_s20 }
  0x5e   : > { %649 = vmatpush.bf16.msrb.mxu0 %v967_v29  ;;  %s815_s22 = sshll.u32 %s180_s21, 4  ;;  %s817_s24 = sshll.u32 %s814_s19, 4  ;;  %s816_s22 = int_to_ptr.vmem [resolvable:$true] %s815_s22  ;;  %s818_s24 = int_to_ptr.hbm [resolvable:$true] %s817_s24 }
  0x5f   : > { %663 = vmatpush.bf16.msrb.mxu1 %v1031_v34  ;;  %s803_s25 = scalar_lea.sflag [#allocation4], %s1586_s5  ;;  %s1411_s26 = sshra.s32 %s818_s24, 4  ;;  %s1412_s26 = int_to_ptr.hbm [resolvable:$true] %s1411_s26 }
  0x60   : > { %677 = vmatpush.bf16.msrb.mxu2 %v1095_v27  ;;  %v996_v27 = vld [vmem:[#allocation5 + $0x88] sm:$0xf0]  ;;  %s1413_s27 = scalar_lea.hbm %s1412_s26, 8  ;;  %s1417_s30 = scalar_lea.hbm %s1672_s2, 16 }
  0x61   : > { %691 = vmatpush.bf16.msrb.mxu3 %v1159_v28  ;;  %v1063_v28 = vor.u32 %v1228_v18, %v1060_v19  ;;  %p1414_p1 = scmp.ne.s32.totalorder %s1412_s26, %s1413_s27  ;;  %p1418_p11 = scmp.lt.s32.totalorder %s1412_s26, %s1672_s2 }
  0x62   : > { %650 = vmatpush.bf16.msrb.mxu0 %v959_v48  ;;  %p1419_p9 = scmp.lt.s32.totalorder %s1417_s30, %s1413_s27 }
  0x63   : > { %664 = vmatpush.bf16.msrb.mxu1 %v1023_v54  ;;  %p1415_p4 = pnand %p1414_p1, %p1558_p7 }
  0x64   : > { %678 = vmatpush.bf16.msrb.mxu2 %v1087_v46  ;;  %p1420_p2 = por %p1419_p9, %p1418_p11 }
  0x65   : > { %692 = vmatpush.bf16.msrb.mxu3 %v1151_v47  ;;  %p1416_p8 = pneg %p1415_p4 }
  0x66   : > { %651 = vmatpush.bf16.msrb.mxu0 %v951_v0 }
  0x67   : > { %665 = vmatpush.bf16.msrb.mxu1 %v1015_v5  ;;  %p1421_p10 = pnand %p1420_p2, %p1416_p8 }
  0x68   : > { %679 = vmatpush.bf16.msrb.mxu2 %v1079_v61 }
  0x69   : > { %693 = vmatpush.bf16.msrb.mxu3 %v1143_v63 }
  0x6a   : > { %652 = vmatpush.bf16.msrb.mxu0 %v943_v17 }
  0x6c   : > { %680 = vmatpush.bf16.msrb.mxu2 %v1071_v14 }
  0x6d   : > { %694 = vmatpush.bf16.msrb.mxu3 %v1135_v16 }
  0x6e   : > { %653 = vmatpush.bf16.msrb.mxu0 %v935_v32 }
  0x70   : > { %681 = vmatpush.bf16.msrb.mxu2 %v1063_v28 }
  0x71   : > { %695 = vmatpush.bf16.msrb.mxu3 %v1127_v31  ;;  %654 = vmatmul.bf16.vlgmr.msrb.gmra.mxu0 %v1608_v40 }
  0x73   : > { %682 = vmatmul.bf16.vlgmr.msrb.gmra.mxu2 %v1612_v42 }
  0x74   : > { %696 = vmatmul.bf16.vlgmr.msrb.gmra.mxu3 %v1614_v43 }
  0xce   : > { %v599_v9 = vpop.f32.mrf.mxu0 }
  0xcf   : > { %v613_v10 = vpop.f32.mrf.mxu1 }
  0xd0   : > { %v614_v26 = vadd.f32 %v613_v10, %v599_v9  ;;  %v1214_v10 = vld [vmem:[#allocation5 + $0x94] sm:$0xf] }
  0xd1   : > { %v1007_v20 = vor.u32 %v1214_v10, %v1004_v11 }
  0xd3   : > { %666 = vmatpush.bf16.msrb.mxu1 %v1007_v20 }
  0xd6   : > { %v627_v33 = vpop.f32.mrf.mxu2  ;;  %v601_v52 = vpop.f32.mrf.mxu0 }
  0xd7   : > { %v641_v38 = vpop.f32.mrf.mxu3  ;;  %v628_v45 = vadd.f32 %v627_v33, %v614_v26  ;;  %v615_v53 = vpop.f32.mrf.mxu1  ;;  %v1212_v26 = vld [vmem:[#allocation5 + $0x84] sm:$0xf] }
  0xd8   : > { %v616_v62 = vadd.f32 %v615_v53, %v601_v52  ;;  %v999_v33 = vor.u32 %v1212_v26, %v996_v27 }
  0xd9   : > { %v642_v60 = vadd.f32 %v641_v38, %v628_v45 }
  0xda   : > { %667 = vmatpush.bf16.msrb.mxu1 %v999_v33 }
  0xdb   : > { %v702_v12 = vpack.c.bf16 %v642_v60, %v642_v60 }
  0xdd   : > { %v708_v29 = vunpack.c.l.b16 %v702_v12  ;;  %668 = vmatmul.bf16.vlgmr.msrb.gmra.mxu1 %v1610_v41 }
  0xde   : > { %v629_v4 = vpop.f32.mrf.mxu2 }
  0xdf   : > { %v630_v9 = vadd.f32 %v629_v4, %v616_v62  ;;  %v643_v13 = vpop.f32.mrf.mxu3  ;;  %v736_v62 = vadd.s32 8, %v735_v57 }
  0xe1   : > { %v644_v15 = vadd.f32 %v643_v13, %v630_v9  ;;  %vm740_vm3 = vcmp.le.s32.totalorder %v738_v58, %v736_v62 }
  0xe3   : > { %v703_v24 = vpack.c.bf16 %v644_v15, %v644_v15 }
  0xe5   : > { %v709_v30 = vunpack.c.l.b16 %v703_v24 }
  0xe7   : > { %v710_v34 = vpack.c.b16 %v709_v30, %v708_v29 }
  0xe9   : > { %711 = vrot.lane.b32.xlu0 %v710_v34, %s1474_s15 }
  0xee   : > { %v655_v37 = vpop.f32.mrf.mxu0 }
  0xf6   : > { %v683_v44 = vpop.f32.mrf.mxu2  ;;  %v657_v47 = vpop.f32.mrf.mxu0 }
  0xf7   : > { %v697_v46 = vpop.f32.mrf.mxu3 }
  0xfe   : > { %v685_v43 = vpop.f32.mrf.mxu2 }
  0xff   : > { %v699_v51 = vpop.f32.mrf.mxu3 }
 0x15a   : > { %v669_v38 = vpop.f32.mrf.mxu1 }
 0x15b   : > { %v712_v35 = vpop.permute.xlu0 %711  ;;  %v670_v39 = vadd.f32 %v669_v38, %v655_v37 }
 0x15c   : > { %v718_v36 = vsel %vm713_vm0, %v712_v35, 0 }
 0x15d   : > { %727 = vmatpush.bf16.xpose.msra.mxu0 %v718_v36  ;;  %v684_v45 = vadd.f32 %v683_v44, %v670_v39 }
 0x15f   : > { %v698_v42 = vadd.f32 %v697_v46, %v684_v45 }
 0x161   : > { %v704_v50 = vpack.c.bf16 %v698_v42, %v698_v42 }
 0x162   : > { %v671_v48 = vpop.f32.mrf.mxu1 }
 0x163   : > { %v672_v49 = vadd.f32 %v671_v48, %v657_v47  ;;  %v777_v52 = vunpack.c.l.b16 %v704_v50 }
 0x164   : > { %1184 = vmatmul.msk.bf16.vlgmr.msra.gmra.mxu0 %vm713_vm0, %v710_v34 }
 0x165   : > { %v686_v40 = vadd.f32 %v685_v43, %v672_v49 }
 0x167   : > { %v700_v41 = vadd.f32 %v699_v51, %v686_v40 }
 0x169   : > { %v705_v53 = vpack.c.bf16 %v700_v41, %v700_v41 }
 0x16b   : > { %v778_v54 = vunpack.c.l.b16 %v705_v53 }
 0x16d   : > { %v779_v55 = vpack.c.b16 %v778_v54, %v777_v52 }
 0x16f   : > { %791 = vmatpush.bf16.msra.mxu1 %v779_v55 }
 0x1e1   : > { %v729_v59 = vpop.f32.mrf.mxu0 }
 0x1e2   : > { %v741_v60 = vsel %vm739_vm1, %v729_v59, -inf }
 0x1e3   : > { %v744_v61 = vsel %vm743_vm2, %v741_v60, -inf }
 0x1e4   : > { %745 = vmax.xlane.f32.xlu0 %v744_v61 }
 0x1e9   : > { %v731_v63 = vpop.f32.mrf.mxu0 }
 0x1ea   : > { %v742_v0 = vsel %vm740_vm3, %v731_v63, -inf }
 0x1eb   : > { %v747_v1 = vsel %vm743_vm2, %v742_v0, -inf }
 0x1ec   : > { %748 = vmax.xlane.f32.xlu1 %v747_v1 }
 0x257   : > { %v746_v2 = vpop.xlane.xlu0 %745 }
 0x258   : > { %v750_v3 = vsub.f32 %v729_v59, %v746_v2 }
 0x25a   : > { %v752_v4 = vmul.f32 1.442695, %v750_v3 }
 0x25c   : > { %1329 = vpow2.f32 %v752_v4 }
 0x25f   : > { %v749_v5 = vpop.xlane.xlu1 %748 }
 0x260   : > { %v751_v6 = vsub.f32 %v731_v63, %v749_v5 }
 0x262   : > { %v1330_v7 = vpop.eup %1329  ;;  %v754_v8 = vmul.f32 1.442695, %v751_v6 }
 0x263   : > { %v756_v9 = vsel %vm739_vm1, %v1330_v7, 0.0 }
 0x264   : > { %1331 = vpow2.f32 %v754_v8  ;;  %v758_v10 = vsel %vm743_vm2, %v756_v9, 0.0 }
 0x265   : > { %759 = vadd.xlane.f32.xlu1 %v758_v10 }
 0x26a   : > { %v1332_v11 = vpop.eup %1331 }
 0x26b   : > { %v757_v12 = vsel %vm740_vm3, %v1332_v11, 0.0 }
 0x26c   : > { %v761_v13 = vsel %vm743_vm2, %v757_v12, 0.0 }
 0x26d   : > { %762 = vadd.xlane.f32.xlu2 %v761_v13 }
 0x2d8   : > { %v760_v14 = vpop.xlane.xlu1 %759 }
 0x2d9   : > { %1333 = vrcp.f32 %v760_v14 }
 0x2df   : > { %v1334_v16 = vpop.eup %1333 }
 0x2e0   : > { %v763_v15 = vpop.xlane.xlu2 %762  ;;  %v766_v17 = vmul.f32 %v1334_v16, %v756_v9 }
 0x2e1   : > { %1335 = vrcp.f32 %v763_v15 }
 0x2e2   : > { %v768_v19 = vpack.c.bf16 %v766_v17, %v766_v17 }
 0x2e4   : > { %v772_v22 = vunpack.c.l.b16 %v768_v19 }
 0x2e7   : > { %v1336_v18 = vpop.eup %1335 }
 0x2e8   : > { %v767_v20 = vmul.f32 %v1336_v18, %v757_v12 }
 0x2ea   : > { %v769_v21 = vpack.c.bf16 %v767_v20, %v767_v20 }
 0x2ec   : > { %v773_v23 = vunpack.c.l.b16 %v769_v21 }
 0x2ee   : > { %v774_v24 = vpack.c.b16 %v773_v23, %v772_v22 }
 0x2f0   : > { %1185 = vmatmul.msk.bf16.vlgmr.msra.gmra.mxu1 %vm743_vm2, %v774_v24 }
 0x36d   : > { %v793_v25 = vpop.f32.mrf.mxu1 }
 0x375   : > { %v795_v26 = vpop.f32.mrf.mxu1 }
 0x376   : > { %v1264_v27 = vpack.c.bf16 %v795_v26, %v793_v25 }
 0x378   : > { %1265 = vst [vmem:[%s180_s21] sm:$0xff] %v1264_v27  }
 0x379   : > { %1424 = shalt.err (!%p1421_p10)
}
 0x37a   : > { %s1475_s5 = smov 4  }
 0x37b   : > { %1272 = dma.vmem_to_hbm [thread:$0]  (%p1558_p7), %s816_s22, 128, %s818_s24, %s803_s25, %s1474_s15, %s1474_s15, %s1475_s5  }
 0x37c PF: > { %s832_s7 = sand.u32 1, %s1455_s9   ;;  %p1678_p12 = scmp.ge.s32.totalorder %s1467_s12, 2 }
 0x37d   : > { %s833_s14 = scalar_lea.sflag [#allocation4], %s832_s7 }
 0x37e   : > { %p1283_p13 = pnand %p1678_p12, %p1526_p6 }
 0x380   : > { %p1284_p0 = pneg %p1283_p13 }
 0x382   : > { %1450 = dma.done.wait (%p1284_p0), %s833_s14, 128  }
 0x383   : > { %1452 = vsyncadd (%p1284_p0), %s833_s14, 4294967168  ;;  %p16_p3 = scmp.ge.s32.totalorder %s1544_s23, 4   ;;  %s1679_s9 = smov %s1459_s10 }
 0x384   : > { %s1680_s10 = smov %s1463_s11  ;;  %s1681_s11 = smov %s1554_s28 }
 0x385   : > { %s1682_s12 = smov %s1544_s23  ;;  %18 = sbr.rel (!%p16_p3) target bundleno = 6 (0x6), region = 77 }
 0x38a   :  { %839 = vsyncpa [#allocation3], 1 }
 0x38b   :  { %841 = vsyncpa [#allocation3 + $0x1], 1 }
 0x38c   :  { %842 = vsyncpa [#allocation6], 1 }
 0x38d   :  { %843 = vsyncpa [#allocation4], 1 }
 0x38e   :  { %845 = vsyncpa [#allocation4 + $0x1], 1 }

</bundles_post_ra>
